<compile_context>
chip_gen: v7x
topology: tpu7x:2x2x1
jax: 0.10.0
libtpu: 0.0.40
codegen_flags: <defaults>
</compile_context>

<pallas_src>
import math

import jax
import jax.numpy as jnp
from jax import lax
from jax.experimental import pallas as pl
from jax.experimental.pallas import tpu as pltpu


def _round_up(x, m):
    return ((x + m - 1) // m) * m


def _make_noisy_linear_kernel(matmul_dtype):
    def kernel(x_ref, w_ref, sw_ref, ew_ref, b_ref, o_ref, acc_ref):
        k = pl.program_id(2)

        @pl.when(k == 0)
        def _():
            acc_ref[...] = jnp.zeros_like(acc_ref)

        # Noisy-weight combine in f32 on the VPU (keeps the small-sigma
        # perturbation precise), then feed the MXU.
        w_eff = w_ref[...] + sw_ref[...] * ew_ref[...]          # (tn, tk) f32
        x_blk = x_ref[...]                                      # (tm, tk)
        if matmul_dtype is not None:
            w_eff = w_eff.astype(matmul_dtype)
            x_blk = x_blk.astype(matmul_dtype)

        # Contract dim 1 of x with dim 1 of w_eff: (tm, tk) x (tn, tk) -> (tm, tn).
        # No transpose is materialized; MXU gets the tiles directly.
        acc_ref[...] += lax.dot_general(
            x_blk, w_eff,
            dimension_numbers=(((1,), (1,)), ((), ())),
            preferred_element_type=jnp.float32)

        @pl.when(k == pl.num_programs(2) - 1)
        def _():
            o_ref[...] = (acc_ref[...] + b_ref[...]).astype(o_ref.dtype)

    return kernel


def noisy_linear(x, weight, sigma_weight, eps_weight, bias, sigma_bias, eps_bias,
                 *, tm_max=128, tn_max=256, tk_max=512, matmul_dtype=None):
    """y = x @ (weight + sigma_weight*eps_weight).T + (bias + sigma_bias*eps_bias)."""
    B, in_f = x.shape
    out_f, _ = weight.shape

    # Tile sizes: sublane-aligned M tile, lane-dense (multiple-of-128) N/K tiles,
    # capped so the 3 double-buffered f32 weight streams stay well under v7x's
    # 64 MiB VMEM (3 * 2 * tn * tk * 4B <= 3 MiB at the caps).
    tm = min(tm_max, _round_up(B, 8))
    tn = min(tn_max, _round_up(out_f, 128))
    tk = min(tk_max, _round_up(in_f, 128))

    Mp = _round_up(B, tm)
    Np = _round_up(out_f, tn)
    Kp = _round_up(in_f, tk)

    def pad2(a, rows, cols):
        return jnp.pad(a, ((0, rows - a.shape[0]), (0, cols - a.shape[1])))

    xp = pad2(x, Mp, Kp)
    wp = pad2(weight, Np, Kp)
    swp = pad2(sigma_weight, Np, Kp)
    ewp = pad2(eps_weight, Np, Kp)

    # Bias noise combine is O(out_f): do it once in the wrapper and stream a
    # single lane-dense (1, Np) row instead of three.
    b_eff = (bias + sigma_bias * eps_bias).reshape(1, out_f)
    bp = jnp.pad(b_eff, ((0, 0), (0, Np - out_f)))

    grid = (Mp // tm, Np // tn, Kp // tk)

    cost = pl.CostEstimate(
        flops=2 * Mp * Np * Kp + 2 * Np * Kp + Mp * Np,
        transcendentals=0,
        bytes_accessed=4 * (Mp * Kp + 3 * Np * Kp + Np + Mp * Np),
    )

    out = pl.pallas_call(
        _make_noisy_linear_kernel(matmul_dtype),
        out_shape=jax.ShapeDtypeStruct((Mp, Np), x.dtype),
        grid_spec=pltpu.PrefetchScalarGridSpec(
            num_scalar_prefetch=0,
            grid=grid,
            in_specs=[
                pl.BlockSpec((tm, tk), lambda i, j, k: (i, k)),   # x
                pl.BlockSpec((tn, tk), lambda i, j, k: (j, k)),   # weight
                pl.BlockSpec((tn, tk), lambda i, j, k: (j, k)),   # sigma_weight
                pl.BlockSpec((tn, tk), lambda i, j, k: (j, k)),   # eps_weight
                pl.BlockSpec((1, tn), lambda i, j, k: (0, j)),    # pre-combined bias
            ],
            out_specs=pl.BlockSpec((tm, tn), lambda i, j, k: (i, j)),
            scratch_shapes=[pltpu.VMEM((tm, tn), jnp.float32)],
        ),
        compiler_params=pltpu.CompilerParams(
            dimension_semantics=("parallel", "parallel", "arbitrary"),
            # Safe on every generation (<= scoped default everywhere); tiles at
            # the caps above use only a few MiB of it.
            vmem_limit_bytes=32 * 1024 * 1024,
        ),
        cost_estimate=cost,
    )(xp, wp, swp, ewp, bp)

    return out[:B, :out_f]


def reference(x, weight, sigma_weight, eps_weight, bias, sigma_bias, eps_bias):
    w_eff = weight + sigma_weight * eps_weight
    b_eff = bias + sigma_bias * eps_bias
    return x @ w_eff.T + b_eff[None, :]


def _make_inputs(key, B, in_f, out_f, sigma_init=0.017):
    k_x, k_w, k_b, k_ew, k_eb = jax.random.split(key, 5)
    std = math.sqrt(3.0 / in_f)
    weight = jax.random.uniform(k_w, (out_f, in_f), minval=-std, maxval=std,
                                dtype=jnp.float32)
    sigma_weight = jnp.full((out_f, in_f), sigma_init / math.sqrt(in_f),
                            dtype=jnp.float32)
    bias = jax.random.uniform(k_b, (out_f,), minval=-std, maxval=std,
                              dtype=jnp.float32)
    sigma_bias = jnp.full((out_f,), sigma_init / math.sqrt(in_f), dtype=jnp.float32)
    # The noise buffers forward() resamples each call (deterministic here).
    eps_weight = jax.random.normal(k_ew, (out_f, in_f), dtype=jnp.float32)
    eps_bias = jax.random.normal(k_eb, (out_f,), dtype=jnp.float32)
    x = jax.random.normal(k_x, (B, in_f), dtype=jnp.float32)
    return x, weight, sigma_weight, eps_weight, bias, sigma_bias, eps_bias


if __name__ == "__main__":
    key = jax.random.PRNGKey(0)
    k0, k1 = jax.random.split(key)

    # --- Test 1: DDQN-sized layer (single-tile grid after padding). ---
    args = _make_inputs(k0, B=8, in_f=32, out_f=64)
    y = jax.block_until_ready(noisy_linear(*args))
    y_ref = reference(*args)
    assert y.shape == (8, 64)
    assert jnp.allclose(y, y_ref, atol=1e-5, rtol=1e-5), "mismatch vs reference (test 1)"

    # --- Test 2: exercises a real multi-tile (M, N, K) grid with K-accumulation. ---
    args2 = _make_inputs(k1, B=16, in_f=256, out_f=256)
    y2 = jax.block_until_ready(
        noisy_linear(*args2, tm_max=8, tn_max=128, tk_max=128))   # grid (2, 2, 2)
    y2_ref = reference(*args2)
    assert y2.shape == (16, 256)
    assert jnp.allclose(y2, y2_ref, atol=2e-4, rtol=1e-5), "mismatch vs reference (test 2)"

    # TODO(synk): optional in-kernel noise generation (pltpu.prng_random_bits) would
    # remove the eps_weight HBM stream, but the module's torch buffers are kept as
    # explicit inputs here to preserve deterministic parity with the reference.

    print("KERNEL_OK")
</pallas_src>

<mosaic_0001>
module attributes {stable_mosaic.version = 11 : i64} {
  func.func @kernel(%arg0: i32, %arg1: i32, %arg2: i32, %arg3: memref<8x128xf32, #tpu.memory_space<vmem>>, %arg4: memref<128x128xf32, #tpu.memory_space<vmem>>, %arg5: memref<128x128xf32, #tpu.memory_space<vmem>>, %arg6: memref<128x128xf32, #tpu.memory_space<vmem>>, %arg7: memref<1x128xf32, #tpu.memory_space<vmem>>, %arg8: memref<8x128xf32, #tpu.memory_space<vmem>>, %arg9: memref<8x128xf32, #tpu.memory_space<vmem>>) attributes {dimension_semantics = [#tpu.dimension_semantics<parallel>, #tpu.dimension_semantics<parallel>, #tpu.dimension_semantics<arbitrary>], iteration_bounds = array<i64: 1, 1, 1>, scalar_prefetch = 0 : i64, scratch_operands = 1 : i64, tpu.core_type = #tpu.core_type<tc>, window_params = [{transform_indices = @transform_0, window_bounds = array<i64: 8, 128>}, {transform_indices = @transform_1, window_bounds = array<i64: 128, 128>}, {transform_indices = @transform_2, window_bounds = array<i64: 128, 128>}, {transform_indices = @transform_3, window_bounds = array<i64: 128, 128>}, {transform_indices = @transform_4, window_bounds = array<i64: 1, 128>}, {transform_indices = @transform_5, window_bounds = array<i64: 8, 128>}]} {
    %c0_i32 = arith.constant 0 : i32
    %0 = arith.cmpi eq, %arg2, %c0_i32 : i32
    %1 = arith.extui %0 : i1 to i32
    %c0_i32_0 = arith.constant 0 : i32
    %2 = arith.cmpi ne, %1, %c0_i32_0 : i32
    scf.if %2 {
      %cst_14 = arith.constant 0.000000e+00 : f32
      %16 = vector.broadcast %cst_14 : f32 to vector<8x128xf32>
      %c0_15 = arith.constant 0 : index
      %c0_16 = arith.constant 0 : index
      %17 = vector.load %arg9[%c0_15, %c0_16] : memref<8x128xf32, #tpu.memory_space<vmem>>, vector<8x128xf32>
      tpu.vector_store %arg9[%c0_15, %c0_16], %16 {strides = array<i32>} : memref<8x128xf32, #tpu.memory_space<vmem>>, vector<8x128xf32>,
    } else {
    }
    %c0 = arith.constant 0 : index
    %c0_1 = arith.constant 0 : index
    %3 = vector.load %arg4[%c0, %c0_1] : memref<128x128xf32, #tpu.memory_space<vmem>>, vector<128x128xf32>
    %c0_2 = arith.constant 0 : index
    %c0_3 = arith.constant 0 : index
    %4 = vector.load %arg5[%c0_2, %c0_3] : memref<128x128xf32, #tpu.memory_space<vmem>>, vector<128x128xf32>
    %c0_4 = arith.constant 0 : index
    %c0_5 = arith.constant 0 : index
    %5 = vector.load %arg6[%c0_4, %c0_5] : memref<128x128xf32, #tpu.memory_space<vmem>>, vector<128x128xf32>
    %6 = arith.mulf %4, %5 : vector<128x128xf32>
    %7 = arith.addf %3, %6 : vector<128x128xf32>
    %c0_6 = arith.constant 0 : index
    %c0_7 = arith.constant 0 : index
    %8 = vector.load %arg3[%c0_6, %c0_7] : memref<8x128xf32, #tpu.memory_space<vmem>>, vector<8x128xf32>
    %c0_8 = arith.constant 0 : index
    %c0_9 = arith.constant 0 : index
    %9 = vector.load %arg9[%c0_8, %c0_9] : memref<8x128xf32, #tpu.memory_space<vmem>>, vector<8x128xf32>
    %cst = arith.constant dense<0.000000e+00> : vector<8x128xf32>
    %10 = tpu.matmul %8, %7, %cst {dimension_numbers = #tpu.dot_dimension_numbers<[1], [1], [0], [0], [0, 0, 1, 0], [], []>} : vector<8x128xf32>, vector<128x128xf32>, vector<8x128xf32> -> vector<8x128xf32>
    %11 = arith.addf %9, %10 : vector<8x128xf32>
    %c0_10 = arith.constant 0 : index
    %c0_11 = arith.constant 0 : index
    %12 = vector.load %arg9[%c0_10, %c0_11] : memref<8x128xf32, #tpu.memory_space<vmem>>, vector<8x128xf32>
    tpu.vector_store %arg9[%c0_10, %c0_11], %11 {strides = array<i32>} : memref<8x128xf32, #tpu.memory_space<vmem>>, vector<8x128xf32>,
    %c0_i32_12 = arith.constant 0 : i32
    %13 = arith.cmpi eq, %arg2, %c0_i32_12 : i32
    %14 = arith.extui %13 : i1 to i32
    %c0_i32_13 = arith.constant 0 : i32
    %15 = arith.cmpi ne, %14, %c0_i32_13 : i32
    scf.if %15 {
      %c0_14 = arith.constant 0 : index
      %c0_15 = arith.constant 0 : index
      %16 = vector.load %arg9[%c0_14, %c0_15] : memref<8x128xf32, #tpu.memory_space<vmem>>, vector<8x128xf32>
      %c0_16 = arith.constant 0 : index
      %c0_17 = arith.constant 0 : index
      %17 = vector.load %arg7[%c0_16, %c0_17] : memref<1x128xf32, #tpu.memory_space<vmem>>, vector<1x128xf32>
      %18 = vector.broadcast %17 : vector<1x128xf32> to vector<8x128xf32>
      %19 = arith.addf %16, %18 : vector<8x128xf32>
      %c0_18 = arith.constant 0 : index
      %c0_19 = arith.constant 0 : index
      %20 = vector.load %arg8[%c0_18, %c0_19] : memref<8x128xf32, #tpu.memory_space<vmem>>, vector<8x128xf32>
      tpu.vector_store %arg8[%c0_18, %c0_19], %19 {strides = array<i32>} : memref<8x128xf32, #tpu.memory_space<vmem>>, vector<8x128xf32>,
    } else {
    }
    return
  }
  func.func @transform_0(%arg0: i32, %arg1: i32, %arg2: i32) -> (i32, i32) {
    %c0_i32 = arith.constant 0 : i32
    return %arg0, %arg2 : i32, i32
  }
  func.func @transform_1(%arg0: i32, %arg1: i32, %arg2: i32) -> (i32, i32) {
    %c0_i32 = arith.constant 0 : i32
    return %arg1, %arg2 : i32, i32
  }
  func.func @transform_2(%arg0: i32, %arg1: i32, %arg2: i32) -> (i32, i32) {
    %c0_i32 = arith.constant 0 : i32
    return %arg1, %arg2 : i32, i32
  }
  func.func @transform_3(%arg0: i32, %arg1: i32, %arg2: i32) -> (i32, i32) {
    %c0_i32 = arith.constant 0 : i32
    return %arg1, %arg2 : i32, i32
  }
  func.func @transform_4(%arg0: i32, %arg1: i32, %arg2: i32) -> (i32, i32) {
    %c0_i32 = arith.constant 0 : i32
    %c0_i32_0 = arith.constant 0 : i32
    return %c0_i32, %arg1 : i32, i32
  }
  func.func @transform_5(%arg0: i32, %arg1: i32, %arg2: i32) -> (i32, i32) {
    %c0_i32 = arith.constant 0 : i32
    return %arg0, %arg1 : i32, i32
  }
}

</mosaic_0001>

<bundles_post_ra>
// kernel: tpu_custom_call.1
= control target key start
LH: loop header
LB: loop body
LE: loop exit
PB: predicated region body
PF: predicated region fallthrough
CT: control target
= control target key end

     0   :  { %10 = vsyncpa [#allocation4], 0  ;;  %s588_s0 = inlined_call_operand.hbm [shape: f32[8,128], index: 0, kind: input, shape index: {}]   ;;  %s589_s1 = inlined_call_operand.hbm [shape: f32[128,128], index: 1, kind: input, shape index: {}]   ;;  %s590_s2 = inlined_call_operand.hbm [shape: f32[128,128], index: 2, kind: input, shape index: {}]   ;;  %s591_s3 = inlined_call_operand.hbm [shape: f32[128,128], index: 3, kind: input, shape index: {}]   ;;  %s592_s4 = inlined_call_operand.vmem [shape: f32[1,128], index: 4, kind: input, shape index: {}]   ;;  %s593_s5 = inlined_call_operand.hbm [shape: f32[8,128], index: 5, kind: output, shape index: {}]  }
   0x1   :  { %11 = vsyncpa [#allocation7], 0 }
   0x2   :  { %12 = vsyncpa [#allocation10], 0 }
   0x3   :  { %13 = vsyncpa [#allocation5], 0  ;;  %s468_s18 = smov [#allocation6]   ;;  %s350_s22 = scalar_lea.hbm %s589_s1, 2048 }
   0x4   :  { %s29_s19 = sshll.u32 %s468_s18, 4  ;;  %p351_p0 = scmp.ne.s32.totalorder %s589_s1, %s350_s22  ;;  %s30_s19 = int_to_ptr.vmem [resolvable:$true] %s29_s19 }
   0x5   :  { %p354_p1 = scmp.lt.u32.totalorder %s350_s22, %s589_s1 }
   0x7   :  { %p356_p2 = pnand %p354_p1, %p351_p0 }
   0x9   :  { %359 = shalt.err (!%p356_p2)
}
   0xa   :  { %s360_s27 = scalar_lea.vmem %s30_s19, 2048  ;;  %p365_p4 = scmp.lt.s32.totalorder %s30_s19, %s30_s19 }
   0xb   :  { %p361_p3 = scmp.ne.s32.totalorder %s30_s19, %s360_s27  ;;  %p366_p5 = scmp.lt.s32.totalorder %s360_s27, %s360_s27 }
   0xd   :  { %p367_p6 = por %p366_p5, %p365_p4 }
   0xf   :  { %p368_p7 = pnand %p367_p6, %p361_p3 }
  0x11   :  { %371 = shalt.err (!%p368_p7)
}
  0x12   :  { %s469_s28 = smov 128   ;;  %s470_s29 = smov 8  }
  0x13   :  { %35 = dma.hbm_to_vmem [thread:$0]  %s589_s1, 2048, %s30_s19, [#allocation7], %s469_s28, %s469_s28, %s470_s29  }
  0x14   :  { %s471_s7 = smov [#allocation3]   ;;  %s472_s9 = smov [#allocation8]  }
  0x15   :  { %s20_s8 = sshll.u32 %s471_s7, 4  ;;  %s41_s10 = sshll.u32 %s472_s9, 4  ;;  %s21_s8 = int_to_ptr.vmem [resolvable:$true] %s20_s8  ;;  %s42_s10 = int_to_ptr.vmem [resolvable:$true] %s41_s10 }
  0x16   :  { %s372_s13 = scalar_lea.hbm %s588_s0, 128 }
  0x17   :  { %p373_p8 = scmp.ne.s32.totalorder %s588_s0, %s372_s13  ;;  %p376_p9 = scmp.lt.u32.totalorder %s372_s13, %s588_s0 }
  0x19   :  { %p378_p10 = pnand %p376_p9, %p373_p8 }
  0x1b   :  { %381 = shalt.err (!%p378_p10)
}
  0x1c   :  { %s382_s1 = scalar_lea.vmem %s21_s8, 128  ;;  %p387_p12 = scmp.lt.s32.totalorder %s21_s8, %s21_s8 }
  0x1d   :  { %p383_p11 = scmp.ne.s32.totalorder %s21_s8, %s382_s1  ;;  %p388_p13 = scmp.lt.s32.totalorder %s382_s1, %s382_s1 }
  0x1f   :  { %p389_p0 = por %p388_p13, %p387_p12 }
  0x21   :  { %p390_p1 = pnand %p389_p0, %p383_p11 }
  0x23   :  { %393 = shalt.err (!%p390_p1)
}
  0x24   :  { %23 = dma.hbm_to_vmem [thread:$0]  %s588_s0, 128, %s21_s8, [#allocation4]  }
  0x25   :  { %s394_s22 = scalar_lea.hbm %s590_s2, 2048 }
  0x26   :  { %p395_p2 = scmp.ne.s32.totalorder %s590_s2, %s394_s22  ;;  %p398_p3 = scmp.lt.u32.totalorder %s394_s22, %s590_s2 }
  0x28   :  { %p400_p4 = pnand %p398_p3, %p395_p2 }
  0x2a   :  { %403 = shalt.err (!%p400_p4)
}
  0x2b   :  { %s404_s27 = scalar_lea.vmem %s42_s10, 2048  ;;  %p409_p6 = scmp.lt.s32.totalorder %s42_s10, %s42_s10 }
  0x2c   :  { %p405_p5 = scmp.ne.s32.totalorder %s42_s10, %s404_s27  ;;  %p410_p7 = scmp.lt.s32.totalorder %s404_s27, %s404_s27 }
  0x2e   :  { %p411_p8 = por %p410_p7, %p409_p6 }
  0x30   :  { %p412_p9 = pnand %p411_p8, %p405_p5 }
  0x32   :  { %415 = shalt.err (!%p412_p9)
}
  0x33   :  { %47 = dma.hbm_to_vmem [thread:$0]  %s590_s2, 2048, %s42_s10, [#allocation7], %s469_s28, %s469_s28, %s470_s29  }
  0x34   :  { %s473_s6 = smov [#allocation9]   ;;  %s416_s11 = scalar_lea.hbm %s591_s3, 2048 }
  0x35   :  { %s53_s7 = sshll.u32 %s473_s6, 4  ;;  %p417_p10 = scmp.ne.s32.totalorder %s591_s3, %s416_s11  ;;  %s54_s7 = int_to_ptr.vmem [resolvable:$true] %s53_s7 }
  0x36   :  { %p420_p11 = scmp.lt.u32.totalorder %s416_s11, %s591_s3 }
  0x38   :  { %p422_p12 = pnand %p420_p11, %p417_p10 }
  0x3a   :  { %425 = shalt.err (!%p422_p12)
}
  0x3b   :  { %s426_s16 = scalar_lea.vmem %s54_s7, 2048  ;;  %p431_p0 = scmp.lt.s32.totalorder %s54_s7, %s54_s7 }
  0x3c   :  { %p427_p13 = scmp.ne.s32.totalorder %s54_s7, %s426_s16  ;;  %p432_p1 = scmp.lt.s32.totalorder %s426_s16, %s426_s16 }
  0x3e   :  { %p433_p2 = por %p432_p1, %p431_p0 }
  0x40   :  { %p434_p3 = pnand %p433_p2, %p427_p13 }
  0x42   :  { %437 = shalt.err (!%p434_p3)
}
  0x43   :  { %59 = dma.hbm_to_vmem [thread:$0]  %s591_s3, 2048, %s54_s7, [#allocation10], %s469_s28, %s469_s28, %s470_s29  }
  0x44   :  { %460 = dma.done.wait [#allocation4], 128  }
  0x45   :  { %461 = vsyncadd [#allocation4], 4294967168 }
  0x46   :  { %462 = dma.done.wait [#allocation7], 4096  }
  0x47   :  { %463 = vsyncadd [#allocation7], 4294963200 }
  0x48   :  { %464 = dma.done.wait [#allocation10], 2048  }
  0x49   :  { %465 = vsyncadd [#allocation10], 4294965248  ;;  %v474_v0 = vmov 0.0|0.0   ;;  %vm475_vm0 = vmmov 0   ;;  %v476_v1 = vmov 0.0   ;;  %v79_v2 = vld [vmem:[#allocation6] sm:$0xff] }
  0x4a   :  { %316 = vmatprep.subr.bf16.mxu0 %v474_v0  ;;  %313 = vmatprep.mubr.msk.f32.mxu0 %vm475_vm0, %v476_v1  ;;  %v80_v3 = vld [vmem:[#allocation6 + $0x8] sm:$0xff]  ;;  %v95_v4 = vld [vmem:[#allocation8] sm:$0xff]  ;;  %v97_v10 = vld [vmem:[#allocation8 + $0x10] sm:$0xff]  ;;  %s477_s29 = smov [#allocation11]  }
  0x4b   :  { %v96_v5 = vld [vmem:[#allocation8 + $0x8] sm:$0xff]  ;;  %v111_v6 = vld [vmem:[#allocation9] sm:$0xff]  ;;  %v98_v11 = vld [vmem:[#allocation8 + $0x18] sm:$0xff]  ;;  %s252_s17 = sshll.u32 %s477_s29, 4  ;;  %s253_s17 = int_to_ptr.vmem [resolvable:$true] %s252_s17 }
  0x4c   :  { %v112_v7 = vld [vmem:[#allocation9 + $0x8] sm:$0xff]  ;;  %v127_v8 = vmul.f32 %v111_v6, %v95_v4  ;;  %v113_v12 = vld [vmem:[#allocation9 + $0x10] sm:$0xff]  ;;  %v114_v13 = vld [vmem:[#allocation9 + $0x18] sm:$0xff]  ;;  %s438_s1 = scalar_lea.vmem %s253_s17, 128  ;;  %p443_p5 = scmp.lt.s32.totalorder %s253_s17, %s253_s17 }
  0x4d   :  { %v128_v9 = vmul.f32 %v112_v7, %v96_v5  ;;  %v129_v16 = vmul.f32 %v113_v12, %v97_v10  ;;  %v130_v17 = vmul.f32 %v114_v13, %v98_v11  ;;  %v81_v18 = vld [vmem:[#allocation6 + $0x10] sm:$0xff]  ;;  %v82_v19 = vld [vmem:[#allocation6 + $0x18] sm:$0xff]  ;;  %v99_v23 = vld [vmem:[#allocation8 + $0x20] sm:$0xff]  ;;  %p439_p4 = scmp.ne.s32.totalorder %s253_s17, %s438_s1  ;;  %p444_p6 = scmp.lt.s32.totalorder %s438_s1, %s438_s1 }
  0x4e   :  { %v143_v14 = vadd.f32 %v127_v8, %v79_v2  ;;  %v100_v24 = vld [vmem:[#allocation8 + $0x28] sm:$0xff]  ;;  %v115_v25 = vld [vmem:[#allocation9 + $0x20] sm:$0xff]  ;;  %v101_v34 = vld [vmem:[#allocation8 + $0x30] sm:$0xff] }
  0x4f   :  { %v144_v15 = vadd.f32 %v128_v9, %v80_v3  ;;  %v145_v21 = vadd.f32 %v129_v16, %v81_v18  ;;  %v146_v22 = vadd.f32 %v130_v17, %v82_v19  ;;  %v116_v26 = vld [vmem:[#allocation9 + $0x28] sm:$0xff]  ;;  %v131_v28 = vmul.f32 %v115_v25, %v99_v23  ;;  %v83_v30 = vld [vmem:[#allocation6 + $0x20] sm:$0xff]  ;;  %v102_v35 = vld [vmem:[#allocation8 + $0x38] sm:$0xff]  ;;  %p445_p7 = por %p444_p6, %p443_p5 }
  0x50   :  { %v132_v29 = vmul.f32 %v116_v26, %v100_v24  ;;  %v84_v31 = vld [vmem:[#allocation6 + $0x28] sm:$0xff]  ;;  %v117_v36 = vld [vmem:[#allocation9 + $0x30] sm:$0xff]  ;;  %v118_v37 = vld [vmem:[#allocation9 + $0x38] sm:$0xff] }
  0x51   :  { %v317_v20 = vpack.c.bf16 %v144_v15, %v143_v14  ;;  %v320_v27 = vpack.c.bf16 %v146_v22, %v145_v21  ;;  %v147_v32 = vadd.f32 %v131_v28, %v83_v30  ;;  %v133_v39 = vmul.f32 %v117_v36, %v101_v34  ;;  %v85_v41 = vld [vmem:[#allocation6 + $0x30] sm:$0xff]  ;;  %v86_v42 = vld [vmem:[#allocation6 + $0x38] sm:$0xff]  ;;  %v103_v45 = vld [vmem:[#allocation8 + $0x40] sm:$0xff]  ;;  %p446_p8 = pnand %p445_p7, %p439_p4 }
  0x52   :  { %v148_v33 = vadd.f32 %v132_v29, %v84_v31  ;;  %v134_v40 = vmul.f32 %v118_v37, %v102_v35  ;;  %v104_v46 = vld [vmem:[#allocation8 + $0x48] sm:$0xff]  ;;  %v119_v47 = vld [vmem:[#allocation9 + $0x40] sm:$0xff]  ;;  %v105_v56 = vld [vmem:[#allocation8 + $0x50] sm:$0xff] }
  0x53   :  { %318 = vmatpush3.bf16.xpose.msra.mxu0 %v317_v20  ;;  %v149_v43 = vadd.f32 %v133_v39, %v85_v41  ;;  %v120_v48 = vld [vmem:[#allocation9 + $0x48] sm:$0xff]  ;;  %v135_v50 = vmul.f32 %v119_v47, %v103_v45  ;;  %v87_v52 = vld [vmem:[#allocation6 + $0x40] sm:$0xff]  ;;  %v106_v57 = vld [vmem:[#allocation8 + $0x58] sm:$0xff] }
  0x54   :  { %319 = vmatprep.subr.bf16.mxu0 %v474_v0  ;;  %v323_v38 = vpack.c.bf16 %v148_v33, %v147_v32  ;;  %v150_v44 = vadd.f32 %v134_v40, %v86_v42  ;;  %v136_v51 = vmul.f32 %v120_v48, %v104_v46  ;;  %v88_v53 = vld [vmem:[#allocation6 + $0x48] sm:$0xff]  ;;  %v121_v58 = vld [vmem:[#allocation9 + $0x50] sm:$0xff]  ;;  %v122_v59 = vld [vmem:[#allocation9 + $0x58] sm:$0xff] }
  0x55   :  { %v151_v54 = vadd.f32 %v135_v50, %v87_v52  ;;  %v137_v61 = vmul.f32 %v121_v58, %v105_v56  ;;  %v138_v62 = vmul.f32 %v122_v59, %v106_v57  ;;  %v89_v63 = vld [vmem:[#allocation6 + $0x50] sm:$0xff]  ;;  %v90_v1 = vld [vmem:[#allocation6 + $0x58] sm:$0xff]  ;;  %v107_v4 = vld [vmem:[#allocation8 + $0x60] sm:$0xff] }
  0x56   :  { %v326_v49 = vpack.c.bf16 %v150_v44, %v149_v43  ;;  %v152_v55 = vadd.f32 %v136_v51, %v88_v53  ;;  %v108_v5 = vld [vmem:[#allocation8 + $0x68] sm:$0xff]  ;;  %v123_v6 = vld [vmem:[#allocation9 + $0x60] sm:$0xff]  ;;  %v109_v15 = vld [vmem:[#allocation8 + $0x70] sm:$0xff] }
  0x57   :  { %v153_v2 = vadd.f32 %v137_v61, %v89_v63  ;;  %v154_v3 = vadd.f32 %v138_v62, %v90_v1  ;;  %v124_v7 = vld [vmem:[#allocation9 + $0x68] sm:$0xff]  ;;  %v139_v9 = vmul.f32 %v123_v6, %v107_v4  ;;  %v91_v11 = vld [vmem:[#allocation6 + $0x60] sm:$0xff]  ;;  %v110_v16 = vld [vmem:[#allocation8 + $0x78] sm:$0xff] }
  0x58   :  { %v329_v60 = vpack.c.bf16 %v152_v55, %v151_v54  ;;  %v140_v10 = vmul.f32 %v124_v7, %v108_v5  ;;  %v92_v12 = vld [vmem:[#allocation6 + $0x68] sm:$0xff]  ;;  %v125_v17 = vld [vmem:[#allocation9 + $0x70] sm:$0xff]  ;;  %v126_v18 = vld [vmem:[#allocation9 + $0x78] sm:$0xff] }
  0x59   :  { %v332_v8 = vpack.c.bf16 %v154_v3, %v153_v2  ;;  %v155_v13 = vadd.f32 %v139_v9, %v91_v11  ;;  %v141_v20 = vmul.f32 %v125_v17, %v109_v15  ;;  %v142_v21 = vmul.f32 %v126_v18, %v110_v16  ;;  %v93_v22 = vld [vmem:[#allocation6 + $0x70] sm:$0xff]  ;;  %v94_v23 = vld [vmem:[#allocation6 + $0x78] sm:$0xff] }
  0x5a   :  { %v156_v14 = vadd.f32 %v140_v10, %v92_v12  ;;  %v263_v28 = vld [vmem:[%s592_s4] ss:$0 sm:$0xff] }
  0x5b   :  { %321 = vmatpush3.bf16.xpose.msra.mxu0 %v320_v27  ;;  %v157_v24 = vadd.f32 %v141_v20, %v93_v22  ;;  %v158_v25 = vadd.f32 %v142_v21, %v94_v23  ;;  %v159_v27 = vld [vmem:[#allocation3] sm:$0xff] }
  0x5c   :  { %322 = vmatprep.subr.bf16.mxu0 %v474_v0  ;;  %v335_v19 = vpack.c.bf16 %v156_v14, %v155_v13 }
  0x5d   :  { %v338_v26 = vpack.c.bf16 %v158_v25, %v157_v24 }
  0x63   :  { %324 = vmatpush3.bf16.xpose.msra.mxu0 %v323_v38 }
  0x64   :  { %325 = vmatprep.subr.bf16.mxu0 %v474_v0 }
  0x6b   :  { %327 = vmatpush3.bf16.xpose.msra.mxu0 %v326_v49 }
  0x6c   :  { %328 = vmatprep.subr.bf16.mxu0 %v474_v0 }
  0x73   :  { %330 = vmatpush3.bf16.xpose.msra.mxu0 %v329_v60 }
  0x74   :  { %331 = vmatprep.subr.bf16.mxu0 %v474_v0 }
  0x7b   :  { %333 = vmatpush3.bf16.xpose.msra.mxu0 %v332_v8 }
  0x7c   :  { %334 = vmatprep.subr.bf16.mxu0 %v474_v0 }
  0x83   :  { %336 = vmatpush3.bf16.xpose.msra.mxu0 %v335_v19 }
  0x84   :  { %337 = vmatprep.subr.bf16.mxu0 %v474_v0 }
  0x8b   :  { %339 = vmatpush3.bf16.xpose.msra.mxu0 %v338_v26 }
  0x92   :  { %314 = vmatmul.mubr.f32.vlgmr.msra.gmra.mrb[0].mxu0 %v159_v27 }
 0x165   :  { %v227_v29 = vpop.f32.mrb[0].mxu0 }
 0x166   :  { %v244_v30 = vadd.f32 %v263_v28, %v227_v29  ;;  %v315_v31 = vpop.f32.mrb[1].mxu0 }
 0x168   :  { %245 = vst [vmem:[#allocation11] sm:$0xff] %v244_v30 }
 0x169   :  { %449 = shalt.err (!%p446_p8)
}
 0x16a   :  { %s450_s20 = scalar_lea.hbm %s593_s5, 128 }
 0x16b   :  { %p451_p9 = scmp.ne.s32.totalorder %s593_s5, %s450_s20  ;;  %p454_p10 = scmp.lt.u32.totalorder %s450_s20, %s593_s5 }
 0x16d   :  { %p456_p11 = pnand %p454_p10, %p451_p9 }
 0x16f   :  { %459 = shalt.err (!%p456_p11)
}
 0x170   :  { %255 = dma.vmem_to_hbm [thread:$0]  %s253_s17, 128, %s593_s5, [#allocation5]  }
 0x171   :  { %466 = dma.done.wait [#allocation5], 128  }
 0x172   :  { %467 = vsyncadd [#allocation5], 4294967168 }
 0x173   :  { %259 = vsyncpa [#allocation4], 1 }
 0x174   :  { %260 = vsyncpa [#allocation7], 1 }
 0x175   :  { %261 = vsyncpa [#allocation10], 1 }
 0x176   :  { %262 = vsyncpa [#allocation5], 1 }

</bundles_post_ra>
